<compile_context>
chip_gen: v7x
topology: tpu7x:2x2x1
jax: 0.10.0
libtpu: 0.0.40
codegen_flags: <defaults>
</compile_context>

<pallas_src>
import functools

import jax
import jax.numpy as jnp
import numpy as np
from jax.experimental import pallas as pl
from jax.experimental.pallas import tpu as pltpu

LANE = 128
SUBLANE = 8

# Single full-array block below this size (one-shot table build; launch/grid overhead
# dominates the math, so never pad/split small tables).
_SINGLE_BLOCK_BYTES = 4 * 1024 * 1024
# Tiled path block budget: only one (double-buffered) output buffer lives in VMEM, so
# 8 MiB blocks are safe on every generation with vmem_limit_bytes raised below.
_MAX_BLOCK_BYTES = 8 * 1024 * 1024
_VMEM_LIMIT_BYTES = 32 * 1024 * 1024


def _round_up(x: int, m: int) -> int:
    return ((x + m - 1) // m) * m


def _pe_kernel(invfreq_ref, bias_ref, o_ref, *, block_rows: int, row_stride: int):
    """angle = pos * inv_freq + bias ; out = sin(angle).

    pos varies only along the sublane (row) axis: a single f32 column iota scaled by
    `row_stride` (positions per output row) plus the block's base offset.  inv_freq
    and bias are grid-invariant (1, D) rows computed on the host, so the per-element
    work is one broadcast fma feeding sin.
    """
    base = (pl.program_id(0) * (block_rows * row_stride)).astype(jnp.float32)
    row = jax.lax.broadcasted_iota(jnp.int32, (block_rows, 1), 0).astype(jnp.float32)
    pos = row * jnp.float32(row_stride) + base                     # (block_rows, 1)
    o_ref[...] = jnp.sin(pos * invfreq_ref[...] + bias_ref[...])   # (block_rows, D)


def _build_slab(rows: int, d_out: int, row_stride: int,
                invfreq_row: np.ndarray, bias_row: np.ndarray) -> jax.Array:
    """Build a (rows, d_out) f32 slab with the Pallas kernel."""
    invf = jnp.asarray(np.asarray(invfreq_row, dtype=np.float32).reshape(1, d_out))
    bias = jnp.asarray(np.asarray(bias_row, dtype=np.float32).reshape(1, d_out))

    row_bytes = d_out * 4
    table_bytes = rows * row_bytes
    if table_bytes <= _SINGLE_BLOCK_BYTES or rows <= SUBLANE:
        # One full-array block: no padding, no grid loop, no wrapper slice.
        block_rows = rows
    else:
        cap = max(SUBLANE, (_MAX_BLOCK_BYTES // row_bytes) // SUBLANE * SUBLANE)
        block_rows = min(cap, max(SUBLANE, (rows // SUBLANE) * SUBLANE))
    grid = (pl.cdiv(rows, block_rows),)

    kernel = functools.partial(_pe_kernel, block_rows=block_rows, row_stride=row_stride)
    return pl.pallas_call(
        kernel,
        out_shape=jax.ShapeDtypeStruct((rows, d_out), jnp.float32),
        grid=grid,
        in_specs=[pl.BlockSpec((1, d_out), lambda i: (0, 0)),
                  pl.BlockSpec((1, d_out), lambda i: (0, 0))],
        out_specs=pl.BlockSpec((block_rows, d_out), lambda i: (i, 0)),
        compiler_params=pltpu.CompilerParams(
            dimension_semantics=("parallel",),
            vmem_limit_bytes=_VMEM_LIMIT_BYTES,
        ),
    )(invf, bias)


def make_sinusoid_table(n_position: int, d_hid: int) -> jax.Array:
    """Builds the (n_position, d_hid) float32 sinusoid table with a Pallas kernel."""
    j = np.arange(d_hid)
    inv_freq = np.power(10000.0, -(2.0 * (j // 2)) / float(d_hid))   # float64 on host
    phase = np.where(j % 2 == 1, np.pi / 2.0, 0.0)                   # cos(x) == sin(x + pi/2)

    if d_hid <= LANE and LANE % d_hid == 0:
        # Lane-dense packed layout: 128 // d_hid positions per 128-lane output row.
        pos_per_row = LANE // d_hid
        n_pos_padded = _round_up(n_position, pos_per_row)
        rows = (n_pos_padded * d_hid) // LANE
        lane = np.arange(LANE)
        hid = lane % d_hid
        invfreq_row = inv_freq[hid]
        # Fold the lane's intra-row position contribution into the bias row.
        bias_row = (lane // d_hid) * inv_freq[hid] + phase[hid]
        slab = _build_slab(rows, LANE, pos_per_row, invfreq_row, bias_row)
        table = slab.reshape(n_pos_padded, d_hid)
        if n_pos_padded != n_position:
            table = table[:n_position]
        return table

    if d_hid % LANE == 0:
        # Natural layout is already lane dense.
        return _build_slab(n_position, d_hid, 1, inv_freq, phase)

    # Fallback (d_hid neither divides nor is a multiple of 128): lane-padded slab so
    # every store is an unmasked full-lane vst; slice the pad lanes off once.
    d_out = _round_up(d_hid, LANE)
    invfreq_row = np.zeros(d_out)
    invfreq_row[:d_hid] = inv_freq
    bias_row = np.zeros(d_out)
    bias_row[:d_hid] = phase
    slab = _build_slab(n_position, d_out, 1, invfreq_row, bias_row)
    return slab[:, :d_hid]


class PositionEmbeddingStandard:
    """JAX/Pallas equivalent of the PyTorch module."""

    def __init__(self, d_hid: int, n_position: int = 200):
        # Buffer built once at init (register_buffer equivalent); float32 for parity.
        self.pos_table = make_sinusoid_table(n_position, d_hid)[None, :, :]  # (1, N, D)

    def __call__(self, x: jax.Array) -> jax.Array:
        # forward: pos_table[:, :x.size(1)]  (clone/detach are no-ops for jax arrays)
        seq_len = x.shape[1]
        return self.pos_table[:, :seq_len, :]


def _numpy_reference(n_position: int, d_hid: int) -> np.ndarray:
    pos = np.arange(n_position, dtype=np.float64)[:, None]
    j = np.arange(d_hid)
    angle = pos / np.power(10000.0, 2.0 * (j // 2) / float(d_hid))
    out = np.empty_like(angle)
    out[:, 0::2] = np.sin(angle[:, 0::2])
    out[:, 1::2] = np.cos(angle[:, 1::2])
    return out[None].astype(np.float32)


if __name__ == "__main__":
    d_hid = 32
    n_position = 200
    batch, seq = 2, 8

    key = jax.random.PRNGKey(0)
    x = jax.random.normal(key, (batch, seq, d_hid), dtype=jnp.float32)

    module = PositionEmbeddingStandard(d_hid=d_hid, n_position=n_position)
    out = jax.block_until_ready(module(x))

    assert out.shape == (1, seq, d_hid), out.shape
    assert out.dtype == jnp.float32, out.dtype

    ref_full = _numpy_reference(n_position, d_hid)
    # Forward semantics (same check as the PyTorch module's sliced buffer).
    np.testing.assert_allclose(np.asarray(out), ref_full[:, :seq, :], rtol=1e-5, atol=1e-5)
    # Full table (f32 in-kernel vs float64 numpy reference).
    np.testing.assert_allclose(np.asarray(module.pos_table), ref_full, rtol=1e-4, atol=1e-4)

    # Fallback lane-padded path (d_hid does not divide 128 and is not a multiple).
    tbl2 = jax.block_until_ready(make_sinusoid_table(24, 48))
    np.testing.assert_allclose(np.asarray(tbl2)[None], _numpy_reference(24, 48),
                               rtol=1e-4, atol=1e-4)

    # Naturally lane-dense path (d_hid % 128 == 0).
    tbl3 = jax.block_until_ready(make_sinusoid_table(64, 256))
    np.testing.assert_allclose(np.asarray(tbl3)[None], _numpy_reference(64, 256),
                               rtol=1e-4, atol=1e-4)

    # Exercise the tiled multi-block (grid > 1, partial last block) path at small size
    # by shrinking the block budgets; normally this path only triggers for big tables.
    _SINGLE_BLOCK_BYTES = 64 * 1024
    _MAX_BLOCK_BYTES = 64 * 1024
    tbl4 = jax.block_until_ready(make_sinusoid_table(576, 64))
    np.testing.assert_allclose(np.asarray(tbl4)[None], _numpy_reference(576, 64),
                               rtol=1e-4, atol=2e-4)

    print("KERNEL_OK")
</pallas_src>

<mosaic_0001>
module attributes {stable_mosaic.version = 11 : i64} {
  func.func @_pe_kernel(%arg0: i32, %arg1: memref<1x128xf32, #tpu.memory_space<vmem>>, %arg2: memref<1x128xf32, #tpu.memory_space<vmem>>, %arg3: memref<50x128xf32, #tpu.memory_space<vmem>>) attributes {dimension_semantics = [#tpu.dimension_semantics<parallel>], iteration_bounds = array<i64: 1>, scalar_prefetch = 0 : i64, scratch_operands = 0 : i64, tpu.core_type = #tpu.core_type<tc>, window_params = [{pipeline_mode = #tpu.pipeline_mode<synchronous>, transform_indices = @transform_0, window_bounds = array<i64: 1, 128>}, {pipeline_mode = #tpu.pipeline_mode<synchronous>, transform_indices = @transform_1, window_bounds = array<i64: 1, 128>}, {transform_indices = @transform_2, window_bounds = array<i64: 50, 128>}]} {
    %c200_i32 = arith.constant 200 : i32
    %0 = arith.muli %arg0, %c200_i32 : i32
    %1 = arith.sitofp %0 : i32 to f32
    %2 = tpu.iota {dimensions = array<i32: 0>} : vector<50x1xi32>
    %3 = arith.sitofp %2 : vector<50x1xi32> to vector<50x1xf32>
    %cst = arith.constant 4.000000e+00 : f32
    %4 = vector.broadcast %cst : f32 to vector<50x1xf32>
    %5 = arith.mulf %3, %4 : vector<50x1xf32>
    %6 = vector.broadcast %1 : f32 to vector<50x1xf32>
    %7 = arith.addf %5, %6 : vector<50x1xf32>
    %c0 = arith.constant 0 : index
    %c0_0 = arith.constant 0 : index
    %8 = vector.load %arg1[%c0, %c0_0] : memref<1x128xf32, #tpu.memory_space<vmem>>, vector<1x128xf32>
    %9 = vector.broadcast %7 : vector<50x1xf32> to vector<50x128xf32>
    %10 = vector.broadcast %8 : vector<1x128xf32> to vector<50x128xf32>
    %11 = arith.mulf %9, %10 : vector<50x128xf32>
    %c0_1 = arith.constant 0 : index
    %c0_2 = arith.constant 0 : index
    %12 = vector.load %arg2[%c0_1, %c0_2] : memref<1x128xf32, #tpu.memory_space<vmem>>, vector<1x128xf32>
    %13 = vector.broadcast %12 : vector<1x128xf32> to vector<50x128xf32>
    %14 = arith.addf %11, %13 : vector<50x128xf32>
    %15 = math.sin %14 : vector<50x128xf32>
    %c0_3 = arith.constant 0 : index
    %c0_4 = arith.constant 0 : index
    %16 = vector.load %arg3[%c0_3, %c0_4] : memref<50x128xf32, #tpu.memory_space<vmem>>, vector<50x128xf32>
    tpu.vector_store %arg3[%c0_3, %c0_4], %15 {strides = array<i32>} : memref<50x128xf32, #tpu.memory_space<vmem>>, vector<50x128xf32>,
    return
  }
  func.func @transform_0(%arg0: i32) -> (i32, i32) {
    %c0_i32 = arith.constant 0 : i32
    %c0_i32_0 = arith.constant 0 : i32
    %c0_i32_1 = arith.constant 0 : i32
    return %c0_i32, %c0_i32_0 : i32, i32
  }
  func.func @transform_1(%arg0: i32) -> (i32, i32) {
    %c0_i32 = arith.constant 0 : i32
    %c0_i32_0 = arith.constant 0 : i32
    %c0_i32_1 = arith.constant 0 : i32
    return %c0_i32, %c0_i32_0 : i32, i32
  }
  func.func @transform_2(%arg0: i32) -> (i32, i32) {
    %c0_i32 = arith.constant 0 : i32
    %c0_i32_0 = arith.constant 0 : i32
    return %arg0, %c0_i32 : i32, i32
  }
}

</mosaic_0001>

<bundles_post_ra>
// kernel: tpu_custom_call.1
= control target key start
LH: loop header
LB: loop body
LE: loop exit
PB: predicated region body
PF: predicated region fallthrough
CT: control target
= control target key end

     0   :  { %7 = vsyncpa [#allocation3], 0  ;;  %s1571_s0 = inlined_call_operand.hbm [shape: f32[1,128], index: 0, kind: input, shape index: {}]   ;;  %s1572_s1 = inlined_call_operand.vmem [shape: f32[1,128], index: 1, kind: input, shape index: {}]   ;;  %s1573_s2 = inlined_call_operand.hbm [shape: f32[50,128], index: 2, kind: output, shape index: {}]  }
   0x1   :  { %8 = vsyncpa [#allocation4], 0  ;;  %s980_s9 = smov [#allocation2]   ;;  %s932_s13 = scalar_lea.hbm %s1571_s0, 16 }
   0x2   :  { %s15_s10 = sshll.u32 %s980_s9, 4  ;;  %p933_p0 = scmp.ne.s32.totalorder %s1571_s0, %s932_s13  ;;  %s16_s10 = int_to_ptr.vmem [resolvable:$true] %s15_s10 }
   0x3   :  { %p936_p1 = scmp.lt.u32.totalorder %s932_s13, %s1571_s0 }
   0x5   :  { %p938_p2 = pnand %p936_p1, %p933_p0 }
   0x7   :  { %941 = shalt.err (!%p938_p2)
}
   0x8   :  { %s942_s18 = scalar_lea.vmem %s16_s10, 16  ;;  %s946_s19 = scalar_lea.vmem %s16_s10, 32 }
   0x9   :  { %p943_p3 = scmp.ne.s32.totalorder %s16_s10, %s942_s18  ;;  %p947_p4 = scmp.lt.s32.totalorder %s16_s10, %s16_s10 }
   0xa   :  { %p948_p5 = scmp.lt.s32.totalorder %s946_s19, %s942_s18 }
   0xc   :  { %p949_p6 = por %p948_p5, %p947_p4 }
   0xe   :  { %p950_p7 = pnand %p949_p6, %p943_p3 }
  0x10   :  { %953 = shalt.err (!%p950_p7)
}
  0x11   :  { %18 = dma.hbm_to_vmem [thread:$0]  %s1571_s0, 16, %s16_s10, [#allocation3]  }
  0x12   :  { %976 = dma.done.wait [#allocation3], 16  }
  0x13   :  { %977 = vsyncadd [#allocation3], 4294967280  ;;  %v26_v0 = vlaneseq  ;;  %v836_v15 = vld [vmem:[#allocation2] ss:$0 sm:$0xff] }
  0x14   :  { %v837_v19 = vld [vmem:[%s1572_s1] ss:$0 sm:$0xff]  ;;  %s987_s1 = smov [#allocation5]  }
  0x15   :  { %v27_v1 = vshrl.u32 %v26_v0, 7  ;;  %s824_s23 = sshll.u32 %s987_s1, 4  ;;  %s825_s23 = int_to_ptr.vmem [resolvable:$true] %s824_s23 }
  0x16   :  { %s954_s24 = scalar_lea.vmem %s825_s23, 896  ;;  %p959_p9 = scmp.lt.s32.totalorder %s825_s23, %s825_s23 }
  0x17   :  { %v28_v2 = vadd.s32 8, %v27_v1  ;;  %v29_v3 = vadd.s32 16, %v27_v1  ;;  %v31_v4 = vadd.s32 32, %v27_v1  ;;  %v32_v5 = vadd.s32 40, %v27_v1  ;;  %p955_p8 = scmp.ne.s32.totalorder %s825_s23, %s954_s24  ;;  %p960_p10 = scmp.lt.s32.totalorder %s954_s24, %s954_s24 }
  0x18   :  { %v33_v6 = vadd.s32 48, %v27_v1  ;;  %v34_v7 = vcvt.s32.f32 %v27_v1  ;;  %v30_v11 = vadd.s32 24, %v27_v1 }
  0x19   :  { %v35_v8 = vcvt.s32.f32 %v28_v2  ;;  %v36_v9 = vcvt.s32.f32 %v29_v3  ;;  %v38_v10 = vcvt.s32.f32 %v31_v4  ;;  %v39_v12 = vcvt.s32.f32 %v32_v5  ;;  %p961_p11 = por %p960_p10, %p959_p9 }
  0x1a   :  { %v40_v13 = vcvt.s32.f32 %v33_v6  ;;  %v41_v14 = vmul.f32 4.0, %v34_v7  ;;  %v37_v26 = vcvt.s32.f32 %v30_v11  ;;  %v981_v2 = vmov 683565275  }
  0x1b   :  { %v42_v16 = vmul.f32 4.0, %v35_v8  ;;  %v43_v17 = vmul.f32 4.0, %v36_v9  ;;  %v45_v18 = vmul.f32 4.0, %v38_v10  ;;  %v46_v20 = vmul.f32 4.0, %v39_v12  ;;  %p962_p12 = pnand %p961_p11, %p955_p8 }
  0x1c   :  { %v47_v21 = vmul.f32 4.0, %v40_v13  ;;  %v63_v22 = vmul.f32 %v836_v15, %v41_v14  ;;  %v44_v38 = vmul.f32 4.0, %v37_v26  ;;  %v982_v4 = vmov 2475754826  }
  0x1d   :  { %v64_v23 = vmul.f32 %v836_v15, %v42_v16  ;;  %v65_v24 = vmul.f32 %v836_v15, %v43_v17  ;;  %v67_v25 = vmul.f32 %v836_v15, %v45_v18  ;;  %v68_v27 = vmul.f32 %v836_v15, %v46_v20 }
  0x1e   :  { %v69_v28 = vmul.f32 %v836_v15, %v47_v21  ;;  %v1020_v29 = vadd.f32 %v837_v19, %v63_v22  ;;  %v66_v46 = vmul.f32 %v836_v15, %v44_v38  ;;  %v983_v6 = vmov 2131351028  }
  0x1f   :  { %v1022_v30 = vadd.f32 %v837_v19, %v64_v23  ;;  %v1024_v31 = vadd.f32 %v837_v19, %v67_v25  ;;  %v1026_v32 = vadd.f32 %v837_v19, %v65_v24  ;;  %v1028_v33 = vadd.f32 %v837_v19, %v68_v27 }
  0x20   :  { %v1030_v34 = vadd.f32 %v837_v19, %v69_v28  ;;  %v84_v35 = vand.u32 2147483647, %v1020_v29  ;;  %v87_v36 = vand.u32 2139095040, %v1020_v29  ;;  %v1042_v55 = vadd.f32 %v837_v19, %v66_v46 }
  0x21   :  { %v188_v37 = vand.u32 2147483647, %v1022_v30  ;;  %v191_v39 = vand.u32 2139095040, %v1022_v30  ;;  %v295_v44 = vand.u32 2139095040, %v1026_v32  ;;  %v292_v53 = vand.u32 2147483647, %v1026_v32 }
  0x22   :  { %v88_v40 = vshrl.u32 %v87_v36, 23  ;;  %v91_v41 = vand.u32 8388607, %v84_v35  ;;  %v984_v8 = vmov 2102212464   ;;  %vm86_vm12 = vcmp.lt.s32.totalorder %v1020_v29, 0 }
  0x23   :  { %v192_v42 = vshrl.u32 %v191_v39, 23  ;;  %v195_v43 = vand.u32 8388607, %v188_v37  ;;  %v296_v48 = vshrl.u32 %v295_v44, 23  ;;  %v1050_v63 = vand.u32 8388607, %v292_v53 }
  0x24   :  { %v838_v45 = vadd.s32 4294967169, %v88_v40  ;;  %v92_v49 = vor.u32 8388608, %v91_v41  ;;  %v985_v10 = vmov 920167782   ;;  %v986_v18 = vmov 1326507024  }
  0x25   :  { %v842_v47 = vadd.s32 4294967169, %v192_v42  ;;  %v196_v51 = vor.u32 8388608, %v195_v43  ;;  %v846_v54 = vadd.s32 4294967169, %v296_v48  ;;  %vm1133_vm14 = vcmp.le.f32.partialorder %v84_v35, 0.7853982 }
  0x26   :  { %v94_v50 = vadd.s32 1, %v838_v45  ;;  %v1044_v59 = vshll.u32 %v92_v49, 8 }
  0x27   :  { %v198_v52 = vadd.s32 1, %v842_v47  ;;  %v1046_v62 = vshll.u32 %v196_v51, 8  ;;  %v1052_v0 = vadd.s32 1, %v846_v54 }
  0x28   :  { %vm95_vm0 = vcmp.gt.s32.totalorder %v94_v50, 0 }
  0x29   :  { %v96_v56 = vsel %vm95_vm0, %v94_v50, 0  ;;  %vm199_vm1 = vcmp.gt.s32.totalorder %v198_v52, 0  ;;  %vm303_vm6 = vcmp.gt.s32.totalorder %v1052_v0, 0 }
  0x2a   :  { %v97_v57 = vshrl.u32 %v96_v56, 5  ;;  %v98_v58 = vand.u32 31, %v96_v56  ;;  %v200_v60 = vsel %vm199_vm1, %v198_v52, 0 }
  0x2b   :  { %v202_v61 = vand.u32 31, %v200_v60  ;;  %v1059_v12 = vshrl.u32 %v200_v60, 5 }
  0x2c   :  { %v99_v1 = vsub.s32 32, %v98_v58  ;;  %v101_v3 = vshll.u32 %v981_v2, %v98_v58  ;;  %v104_v5 = vshll.u32 %v982_v4, %v98_v58  ;;  %v107_v7 = vshll.u32 %v983_v6, %v98_v58 }
  0x2d   :  { %v110_v9 = vshll.u32 %v984_v8, %v98_v58  ;;  %v113_v11 = vshll.u32 %v985_v10, %v98_v58  ;;  %vm116_vm2 = vcmp.lt.s32.totalorder %v97_v57, 1  ;;  %vm117_vm3 = vcmp.lt.s32.totalorder %v97_v57, 2 }
  0x2e   :  { %v100_v13 = vshrl.u32 %v981_v2, %v99_v1  ;;  %v102_v14 = vshrl.u32 %v982_v4, %v99_v1  ;;  %v105_v15 = vshrl.u32 %v983_v6, %v99_v1  ;;  %v108_v16 = vshrl.u32 %v984_v8, %v99_v1 }
  0x2f   :  { %v111_v17 = vshrl.u32 %v985_v10, %v99_v1  ;;  %v114_v19 = vshrl.u32 %v986_v18, %v99_v1  ;;  %vm119_vm4 = vcmp.lt.s32.totalorder %v97_v57, 4  ;;  %v203_v23 = vsub.s32 32, %v202_v61 }
  0x30   :  { %v103_v20 = vor.u32 %v102_v14, %v101_v3  ;;  %v106_v21 = vor.u32 %v105_v15, %v104_v5  ;;  %v109_v22 = vor.u32 %v108_v16, %v107_v7  ;;  %vm118_vm5 = vcmp.lt.s32.totalorder %v97_v57, 3 }
  0x31   :  { %v112_v24 = vor.u32 %v111_v17, %v110_v9  ;;  %v115_v25 = vor.u32 %v114_v19, %v113_v11  ;;  %v205_v26 = vshll.u32 %v981_v2, %v202_v61  ;;  %v208_v42 = vshll.u32 %v982_v4, %v202_v61 }
  0x32   :  { %v120_v27 = vsel %vm116_vm2, %v100_v13, %v103_v20  ;;  %v121_v28 = vsel %vm119_vm4, %v109_v22, 2102212464  ;;  %v124_v36 = vsel %vm116_vm2, %v103_v20, %v106_v21  ;;  %v128_v38 = vsel %vm116_vm2, %v106_v21, %v109_v22 }
  0x33   :  { %v122_v39 = vsel %vm118_vm5, %v106_v21, %v121_v28  ;;  %v125_v40 = vsel %vm119_vm4, %v112_v24, 920167782  ;;  %v129_v41 = vsel %vm119_vm4, %v115_v25, 1326507024  ;;  %v204_v45 = vshrl.u32 %v981_v2, %v203_v23 }
  0x34   :  { %v126_v43 = vsel %vm118_vm5, %v109_v22, %v125_v40  ;;  %v130_v44 = vsel %vm118_vm5, %v112_v24, %v129_v41  ;;  %v206_v46 = vshrl.u32 %v982_v4, %v203_v23  ;;  %v123_v47 = vsel %vm117_vm3, %v120_v27, %v122_v39 }
  0x35   :  { %v127_v48 = vsel %vm117_vm3, %v124_v36, %v126_v43  ;;  %v131_v49 = vsel %vm117_vm3, %v128_v38, %v130_v44  ;;  %v209_v50 = vshrl.u32 %v983_v6, %v203_v23  ;;  %v211_v1 = vshll.u32 %v983_v6, %v202_v61 }
  0x36   :  { %v1080_v51 = vmul.u32.u64.low %v1044_v59, %v131_v49  ;;  %v1081_v52 = vmul.u32.u64.high %v1044_v59, %v131_v49, %v1080_v51  ;;  %v1084_v54 = vmul.u32.u64.low %v1044_v59, %v127_v48  ;;  %v1085_v56 = vmul.u32.u64.high %v1044_v59, %v127_v48, %v1084_v54 }
  0x37   :  { %v207_v58 = vor.u32 %v206_v46, %v205_v26  ;;  %v210_v60 = vor.u32 %v209_v50, %v208_v42  ;;  %v212_v3 = vshrl.u32 %v984_v8, %v203_v23  ;;  %v214_v57 = vshll.u32 %v984_v8, %v202_v61 }
  0x38   :  { %v215_v5 = vshrl.u32 %v985_v10, %v203_v23  ;;  %v217_v7 = vshll.u32 %v985_v10, %v202_v61  ;;  %v218_v9 = vshrl.u32 %v986_v18, %v203_v23  ;;  %v139_v11 = vmul.u32 %v1044_v59, %v123_v47 }
  0x39   :  { %v213_v13 = vor.u32 %v212_v3, %v211_v1  ;;  %vm220_vm7 = vcmp.lt.s32.totalorder %v1059_v12, 1  ;;  %vm221_vm8 = vcmp.lt.s32.totalorder %v1059_v12, 2  ;;  %vm141_vm9 = vc.u32 %v1081_v52, %v1084_v54 }
  0x3a   :  { %v142_v14 = vadd.s32 1, %v1085_v56  ;;  %v216_v15 = vor.u32 %v215_v5, %v214_v57  ;;  %vm222_vm10 = vcmp.lt.s32.totalorder %v1059_v12, 3  ;;  %v219_v16 = vor.u32 %v218_v9, %v217_v7 }
  0x3b   :  { %vm223_vm11 = vcmp.lt.s32.totalorder %v1059_v12, 4  ;;  %v224_v61 = vsel %vm220_vm7, %v204_v45, %v207_v58  ;;  %v228_v17 = vsel %vm220_vm7, %v207_v58, %v210_v60  ;;  %v232_v21 = vsel %vm220_vm7, %v210_v60, %v213_v13 }
  0x3c   :  { %v143_v59 = vsel %vm141_vm9, %v142_v14, %v1085_v56  ;;  %v225_v19 = vsel %vm223_vm11, %v213_v13, 2102212464  ;;  %v229_v20 = vsel %vm223_vm11, %v216_v15, 920167782  ;;  %v233_v25 = vsel %vm223_vm11, %v219_v16, 1326507024 }
  0x3d   :  { %v144_v22 = vadd.s32 %v143_v59, %v139_v11  ;;  %v226_v23 = vsel %vm222_vm10, %v210_v60, %v225_v19  ;;  %v230_v24 = vsel %vm222_vm10, %v213_v13, %v229_v20  ;;  %v234_v28 = vsel %vm222_vm10, %v216_v15, %v233_v25 }
  0x3e   :  { %v227_v26 = vsel %vm221_vm8, %v224_v61, %v226_v23  ;;  %v231_v27 = vsel %vm221_vm8, %v228_v17, %v230_v24  ;;  %v304_v36 = vsel %vm303_vm6, %v1052_v0, 0  ;;  %v235_v39 = vsel %vm221_vm8, %v232_v21, %v234_v28 }
  0x3f   :  { %v145_v38 = vadd.s32 536870912, %v144_v22  ;;  %v1113_v40 = vmul.u32.u64.low %v1046_v62, %v231_v27  ;;  %v1114_v41 = vmul.u32.u64.high %v1046_v62, %v231_v27, %v1113_v40  ;;  %v300_v44 = vor.u32 8388608, %v1050_v63 }
  0x40   :  { %v1118_v42 = vmul.u32.u64.low %v1046_v62, %v235_v39  ;;  %v1119_v43 = vmul.u32.u64.high %v1046_v62, %v235_v39, %v1118_v42  ;;  %v399_v45 = vand.u32 2139095040, %v1042_v55  ;;  %v306_v47 = vand.u32 31, %v304_v36 }
  0x41   :  { %v146_v46 = vshrl.u32 %v145_v38, 30  ;;  %v243_v0 = vmul.u32 %v1046_v62, %v227_v26  ;;  %v246_v48 = vadd.s32 1, %v1114_v41  ;;  %v1128_v50 = vshll.u32 %v300_v44, 8 }
  0x42   :  { %v307_v49 = vsub.s32 32, %v306_v47  ;;  %vm245_vm13 = vc.u32 %v1119_v43, %v1113_v40  ;;  %v396_v51 = vand.u32 2147483647, %v1042_v55  ;;  %v400_v63 = vshrl.u32 %v399_v45, 23 }
  0x43   :  { %v147_v12 = vshll.u32 %v146_v46, 30  ;;  %v170_v58 = vsub.s32 4, %v146_v46  ;;  %v247_v60 = vsel %vm245_vm13, %v246_v48, %v1114_v41  ;;  %v305_v1 = vshrl.u32 %v304_v36, 5 }
  0x44   :  { %v248_v3 = vadd.s32 %v247_v60, %v243_v0  ;;  %v309_v57 = vshll.u32 %v981_v2, %v306_v47  ;;  %v310_v5 = vshrl.u32 %v982_v4, %v307_v49  ;;  %v312_v7 = vshll.u32 %v982_v4, %v306_v47 }
  0x45   :  { %v1137_v62 = vsub.s32 %v144_v22, %v147_v12  ;;  %v313_v35 = vshrl.u32 %v983_v6, %v307_v49  ;;  %v315_v11 = vshll.u32 %v983_v6, %v306_v47  ;;  %v316_v13 = vshrl.u32 %v984_v8, %v307_v49 }
  0x46   :  { %v140_v14 = vadd.s32 %v1084_v54, %v1081_v52  ;;  %v249_v15 = vadd.s32 536870912, %v248_v3  ;;  %v318_v16 = vshll.u32 %v984_v8, %v306_v47  ;;  %v850_v61 = vadd.s32 4294967169, %v400_v63 }
  0x47   :  { %v150_v9 = vsub.s32 0, %v1137_v62  ;;  %v171_v59 = vsel %vm86_vm12, %v170_v58, %v146_v46  ;;  %v319_v19 = vshrl.u32 %v985_v10, %v307_v49  ;;  %vm327_vm15 = vcmp.lt.s32.totalorder %v305_v1, 4 }
  0x48   :  { %v1154_v20 = vshrl.u32 %v249_v15, 30  ;;  %v308_v21 = vshrl.u32 %v981_v2, %v307_v49  ;;  %v321_v22 = vshll.u32 %v985_v10, %v306_v47  ;;  %v322_v52 = vshrl.u32 %v986_v18, %v307_v49 }
  0x49   :  { %v839_v17 = vmin.u32 %v150_v9, %v1137_v62  ;;  %v311_v23 = vor.u32 %v310_v5, %v309_v57  ;;  %v314_v24 = vor.u32 %v313_v35, %v312_v7  ;;  %v317_v25 = vor.u32 %v316_v13, %v315_v11 }
  0x4a   :  { %v251_v26 = vshll.u32 %v1154_v20, 30  ;;  %v320_v27 = vor.u32 %v319_v19, %v318_v16  ;;  %vm324_vm0 = vcmp.lt.s32.totalorder %v305_v1, 1  ;;  %vm326_vm1 = vcmp.lt.s32.totalorder %v305_v1, 3 }
  0x4b   :  { %v152_v54 = vclz %v839_v17  ;;  %v323_v36 = vor.u32 %v322_v52, %v321_v22  ;;  %v329_v38 = vsel %vm327_vm15, %v317_v25, 2102212464  ;;  %v406_v39 = vadd.s32 1, %v850_v61 }
  0x4c   :  { %v173_v41 = vsel %vm1133_vm14, 0, %v171_v59  ;;  %v1163_v42 = vsub.s32 %v248_v3, %v251_v26  ;;  %vm325_vm2 = vcmp.lt.s32.totalorder %v305_v1, 2  ;;  %v333_v44 = vsel %vm327_vm15, %v320_v27, 920167782 }
  0x4d   :  { %v840_v28 = vadd.s32 4294967294, %v152_v54  ;;  %v328_v45 = vsel %vm324_vm0, %v308_v21, %v311_v23  ;;  %v332_v46 = vsel %vm324_vm0, %v311_v23, %v314_v24  ;;  %v334_v47 = vsel %vm326_vm1, %v317_v25, %v333_v44 }
  0x4e   :  { %v254_v12 = vsub.s32 0, %v1163_v42  ;;  %v330_v48 = vsel %vm326_vm1, %v314_v24, %v329_v38  ;;  %v336_v49 = vsel %vm324_vm0, %v314_v24, %v317_v25  ;;  %v337_v3 = vsel %vm327_vm15, %v323_v36, 1326507024 }
  0x4f   :  { %vm841_vm3 = vcmp.lt.s32.totalorder %v840_v28, 0  ;;  %vm190_vm4 = vcmp.lt.s32.totalorder %v1022_v30, 0  ;;  %v335_v5 = vsel %vm325_vm2, %v332_v46, %v334_v47  ;;  %v338_v7 = vsel %vm326_vm1, %v320_v27, %v337_v3 }
  0x50   :  { %v155_v0 = vsel %vm841_vm3, 0, %v840_v28  ;;  %v843_v57 = vmin.u32 %v254_v12, %v1163_v42  ;;  %v339_v11 = vsel %vm325_vm2, %v336_v49, %v338_v7  ;;  %vm407_vm5 = vcmp.gt.s32.totalorder %v406_v39, 0 }
  0x51   :  { %v156_v63 = vsub.s32 32, %v155_v0  ;;  %v157_v58 = vshll.u32 %v1137_v62, %v155_v0  ;;  %v160_v60 = vsub.s32 4294967266, %v155_v0  ;;  %v177_v13 = vadd.s32 3, %v173_v41 }
  0x52   :  { %v256_v15 = vclz %v843_v57  ;;  %v331_v62 = vsel %vm325_vm2, %v328_v45, %v330_v48  ;;  %v1182_v16 = vand.u32 8388607, %v396_v51  ;;  %v408_v52 = vsel %vm407_vm5, %v406_v39, 0 }
  0x53   :  { %v158_v9 = vshrl.u32 %v140_v14, %v156_v63  ;;  %v161_v35 = vadd.s32 127, %v160_v60  ;;  %v1185_v59 = vmul.u32.u64.low %v1128_v50, %v339_v11  ;;  %v1186_v19 = vmul.u32.u64.high %v1128_v50, %v339_v11, %v1185_v59 }
  0x54   :  { %v844_v21 = vadd.s32 4294967294, %v256_v15  ;;  %v1189_v14 = vmul.u32.u64.low %v1128_v50, %v335_v5  ;;  %v1190_v22 = vmul.u32.u64.high %v1128_v50, %v335_v5, %v1189_v14  ;;  %v274_v23 = vsub.s32 4, %v1154_v20 }
  0x55   :  { %v159_v61 = vor.u32 %v158_v9, %v157_v58  ;;  %v162_v17 = vshll.u32 %v161_v35, 23  ;;  %v410_v24 = vand.u32 31, %v408_v52  ;;  %v1194_v25 = vand.u32 3, %v177_v13 }
  0x56   :  { %v244_v26 = vadd.s32 %v1113_v40, %v1119_v43  ;;  %vm845_vm6 = vcmp.lt.s32.totalorder %v844_v21, 0  ;;  %v404_v27 = vor.u32 8388608, %v1182_v16  ;;  %v347_v38 = vmul.u32 %v1128_v50, %v331_v62 }
  0x57   :  { %v163_v54 = vor.u32 4788187, %v162_v17  ;;  %v166_v1 = vcvt.s32.f32 %v159_v61  ;;  %v259_v36 = vsel %vm845_vm6, 0, %v844_v21  ;;  %vm349_vm7 = vc.u32 %v1186_v19, %v1189_v14 }
  0x58   :  { %vm1204_vm8 = vcmp.le.f32.partialorder %v188_v37, 0.7853982  ;;  %v260_v41 = vsub.s32 32, %v259_v36  ;;  %v261_v44 = vshll.u32 %v1163_v42, %v259_v36  ;;  %v264_v40 = vsub.s32 4294967266, %v259_v36 }
  0x59   :  { %v164_v28 = vand.u32 2147483647, %v163_v54  ;;  %v350_v43 = vadd.s32 1, %v1190_v22  ;;  %v275_v50 = vsel %vm190_vm4, %v274_v23, %v1154_v20  ;;  %v1213_v46 = vshrl.u32 %v408_v52, 5 }
  0x5a   :  { %v411_v47 = vsub.s32 32, %v410_v24  ;;  %v262_v0 = vshrl.u32 %v244_v26, %v260_v41  ;;  %v265_v12 = vadd.s32 127, %v264_v40  ;;  %v413_v48 = vshll.u32 %v981_v2, %v410_v24 }
  0x5b   :  { %v167_v45 = vmul.f32 %v166_v1, %v164_v28  ;;  %v351_v37 = vsel %vm349_vm7, %v350_v43, %v1190_v22  ;;  %v416_v58 = vshll.u32 %v982_v4, %v410_v24  ;;  %v419_v20 = vshll.u32 %v983_v6, %v410_v24 }
  0x5c   :  { %v352_v63 = vadd.s32 %v351_v37, %v347_v38  ;;  %v414_v42 = vshrl.u32 %v982_v4, %v411_v47  ;;  %v263_v60 = vor.u32 %v262_v0, %v261_v44  ;;  %v266_v3 = vshll.u32 %v265_v12, 23 }
  0x5d   :  { %v168_v49 = vxor.u32 2147483648, %v167_v45  ;;  %v417_v57 = vshrl.u32 %v983_v6, %v411_v47  ;;  %v420_v9 = vshrl.u32 %v984_v8, %v411_v47  ;;  %v422_v35 = vshll.u32 %v984_v8, %v410_v24 }
  0x5e   :  { %v353_v7 = vadd.s32 536870912, %v352_v63  ;;  %v267_v13 = vor.u32 4788187, %v266_v3  ;;  %v270_v15 = vcvt.s32.f32 %v263_v60  ;;  %v415_v62 = vor.u32 %v414_v42, %v413_v48 }
  0x5f   :  { %v169_v5 = vsel %vm86_vm12, %v168_v49, %v167_v45  ;;  %v418_v61 = vor.u32 %v417_v57, %v416_v58  ;;  %v423_v17 = vshrl.u32 %v985_v10, %v411_v47  ;;  %v425_v21 = vshll.u32 %v985_v10, %v410_v24 }
  0x60   :  { %v172_v11 = vsel %vm1133_vm14, %v1020_v29, %v169_v5  ;;  %v354_v16 = vshrl.u32 %v353_v7, 30  ;;  %v268_v59 = vand.u32 2147483647, %v267_v13  ;;  %v426_v22 = vshrl.u32 %v986_v18, %v411_v47 }
  0x61   :  { %904 = vcosq.f32 %v172_v11  ;;  %v277_v52 = vsel %vm1204_vm8, 0, %v275_v50  ;;  %v424_v56 = vor.u32 %v423_v17, %v422_v35  ;;  %vm428_vm9 = vcmp.lt.s32.totalorder %v1213_v46, 1 }
  0x62   :  { %906 = vsinq.f32 %v172_v11  ;;  %v355_v54 = vshll.u32 %v354_v16, 30  ;;  %vm180_vm10 = vcmp.eq.s32.totalorder %v1194_v25, 0  ;;  %v271_v1 = vmul.f32 %v270_v15, %v268_v59 }
  0x63   :  { %v412_v23 = vshrl.u32 %v981_v2, %v411_v47  ;;  %v421_v26 = vor.u32 %v420_v9, %v419_v20  ;;  %v1236_v28 = vshll.u32 %v404_v27, 8  ;;  %vm179_vm11 = vcmp.lt.s32.totalorder %v1194_v25, 2 }
  0x64   :  { %vm294_vm12 = vcmp.lt.s32.totalorder %v1026_v32, 0  ;;  %v1240_v24 = vsub.s32 %v352_v63, %v355_v54  ;;  %v427_v36 = vor.u32 %v426_v22, %v425_v21  ;;  %vm430_vm13 = vcmp.lt.s32.totalorder %v1213_v46, 3 }
  0x65   :  { %vm431_vm14 = vcmp.lt.s32.totalorder %v1213_v46, 4  ;;  %vm176_vm15 = vweird.f32 %v1020_v29  ;;  %v272_v38 = vxor.u32 2147483648, %v271_v1  ;;  %vm429_vm0 = vcmp.lt.s32.totalorder %v1213_v46, 2 }
  0x66   :  { %v433_v27 = vsel %vm431_vm14, %v421_v26, 2102212464  ;;  %v436_v41 = vsel %vm428_vm9, %v415_v62, %v418_v61  ;;  %v281_v44 = vadd.s32 3, %v277_v52  ;;  %v358_v40 = vsub.s32 0, %v1240_v24 }
  0x67   :  { %v378_v43 = vsub.s32 4, %v354_v16  ;;  %v437_v45 = vsel %vm431_vm14, %v424_v56, 920167782  ;;  %v273_v50 = vsel %vm190_vm4, %v272_v38, %v271_v1  ;;  %v432_v47 = vsel %vm428_vm9, %v412_v23, %v415_v62 }
  0x68   :  { %v434_v0 = vsel %vm430_vm13, %v418_v61, %v433_v27  ;;  %v438_v12 = vsel %vm430_vm13, %v421_v26, %v437_v45  ;;  %v276_v37 = vsel %vm1204_vm8, %v1022_v30, %v273_v50  ;;  %vm1266_vm1 = vcmp.le.f32.partialorder %v292_v53, 0.7853982 }
  0x69   :  { %v847_v49 = vmin.u32 %v358_v40, %v1240_v24  ;;  %v439_v63 = vsel %vm429_vm0, %v436_v41, %v438_v12  ;;  %v440_v42 = vsel %vm428_vm9, %v418_v61, %v421_v26  ;;  %908 = vcosq.f32 %v276_v37 }
  0x6a   :  { %v441_v58 = vsel %vm431_vm14, %v427_v36, 1326507024  ;;  %v1278_v39 = vmul.u32.u64.low %v1236_v28, %v439_v63  ;;  %v1279_v60 = vmul.u32.u64.high %v1236_v28, %v439_v63, %v1278_v39  ;;  %vm183_vm2 = vcmp.eq.s32.totalorder %v1194_v25, 2 }
  0x6b   :  { %v905_v53 = vpop.eup %904  ;;  %910 = vsinq.f32 %v276_v37  ;;  %v282_v3 = vand.u32 3, %v281_v44  ;;  %v360_v57 = vclz %v847_v49  ;;  %v348_v7 = vadd.s32 %v1189_v14, %v1186_v19 }
  0x6c   :  { %v907_v20 = vpop.eup %906  ;;  %v184_v5 = vxor.u32 2147483648, %v905_v53  ;;  %v442_v9 = vsel %vm430_vm13, %v424_v56, %v441_v58  ;;  %v500_v35 = vand.u32 2147483647, %v1024_v31  ;;  %v435_v15 = vsel %vm429_vm0, %v432_v47, %v434_v0 }
  0x6d   :  { %v181_v11 = vxor.u32 2147483648, %v907_v20  ;;  %v848_v13 = vadd.s32 4294967294, %v360_v57  ;;  %v443_v62 = vsel %vm429_vm0, %v440_v42, %v442_v9  ;;  %v379_v17 = vsel %vm294_vm12, %v378_v43, %v354_v16 }
  0x6e   :  { %v185_v61 = vsel %vm183_vm2, %v184_v5, %v907_v20  ;;  %v1295_v59 = vmul.u32.u64.low %v1236_v28, %v443_v62  ;;  %v1296_v19 = vmul.u32.u64.high %v1236_v28, %v443_v62, %v1295_v59  ;;  %vm280_vm3 = vweird.f32 %v1022_v30 }
  0x6f   :  { %v182_v14 = vsel %vm180_vm10, %v905_v53, %v181_v11  ;;  %vm849_vm4 = vcmp.lt.s32.totalorder %v848_v13, 0  ;;  %v454_v21 = vadd.s32 1, %v1279_v60  ;;  %v503_v22 = vand.u32 2139095040, %v1024_v31 }
  0x70   :  { %v186_v46 = vsel %vm179_vm11, %v182_v14, %v185_v61  ;;  %vm283_vm5 = vcmp.lt.s32.totalorder %v282_v3, 2  ;;  %v363_v52 = vsel %vm849_vm4, 0, %v848_v13  ;;  %v451_v16 = vmul.u32 %v1236_v28, %v435_v15 }
  0x71   :  { %v187_v54 = vsel %vm176_vm15, nan, %v186_v46  ;;  %v364_v56 = vsub.s32 32, %v363_v52  ;;  %v365_v1 = vshll.u32 %v1240_v24, %v363_v52  ;;  %v368_v23 = vsub.s32 4294967266, %v363_v52 }
  0x72   :  { %vm284_vm6 = vcmp.eq.s32.totalorder %v282_v3, 0  ;;  %v381_v26 = vsel %vm1266_vm1, 0, %v379_v17  ;;  %vm453_vm7 = vc.u32 %v1296_v19, %v1278_v39  ;;  %v504_v25 = vshrl.u32 %v503_v22, 23  ;;  %812 = vst [vmem:[#allocation5] sm:$0xff] %v187_v54 }
  0x73   :  { %v366_v36 = vshrl.u32 %v348_v7, %v364_v56  ;;  %v369_v38 = vadd.s32 127, %v368_v23  ;;  %v455_v28 = vsel %vm453_vm7, %v454_v21, %v1279_v60  ;;  %v507_v29 = vand.u32 8388607, %v500_v35  ;;  %v909_v27 = vpop.eup %908 }
  0x74   :  { %vm287_vm8 = vcmp.eq.s32.totalorder %v282_v3, 2  ;;  %v456_v24 = vadd.s32 %v455_v28, %v451_v16  ;;  %v854_v41 = vadd.s32 4294967169, %v504_v25  ;;  %v604_v44 = vand.u32 2147483647, %v1028_v33 }
  0x75   :  { %v911_v40 = vpop.eup %910  ;;  %v288_v43 = vxor.u32 2147483648, %v909_v27  ;;  %v367_v45 = vor.u32 %v366_v36, %v365_v1  ;;  %v370_v50 = vshll.u32 %v369_v38, 23  ;;  %v607_v47 = vand.u32 2139095040, %v1028_v33 }
  0x76   :  { %v285_v0 = vxor.u32 2147483648, %v911_v40  ;;  %v385_v12 = vadd.s32 3, %v381_v26  ;;  %v457_v37 = vadd.s32 536870912, %v456_v24  ;;  %v510_v49 = vadd.s32 1, %v854_v41 }
  0x77   :  { %v289_v63 = vsel %vm287_vm8, %v288_v43, %v911_v40  ;;  %v371_v42 = vor.u32 4788187, %v370_v50  ;;  %v374_v58 = vcvt.s32.f32 %v367_v45  ;;  %v508_v60 = vor.u32 8388608, %v507_v29 }
  0x78   :  { %v286_v53 = vsel %vm284_vm6, %v909_v27, %v285_v0  ;;  %v1319_v57 = vshrl.u32 %v457_v37, 30  ;;  %vm511_vm9 = vcmp.gt.s32.totalorder %v510_v49, 0  ;;  %v611_v20 = vand.u32 8388607, %v604_v44 }
  0x79   :  { %v290_v5 = vsel %vm283_vm5, %v286_v53, %v289_v63  ;;  %v372_v7 = vand.u32 2147483647, %v371_v42  ;;  %v512_v9 = vsel %vm511_vm9, %v510_v49, 0  ;;  %v608_v11 = vshrl.u32 %v607_v47, 23 }
  0x7a   :  { %v291_v13 = vsel %vm280_vm3, nan, %v290_v5  ;;  %v459_v15 = vshll.u32 %v1319_v57, 30  ;;  %v514_v61 = vand.u32 31, %v512_v9  ;;  %v1327_v17 = vand.u32 3, %v385_v12 }
  0x7b   :  { %v375_v62 = vmul.f32 %v374_v58, %v372_v7  ;;  %813 = vst [vmem:[#allocation5 + $0x8] sm:$0xff] %v291_v13  ;;  %v452_v59 = vadd.s32 %v1278_v39, %v1296_v19  ;;  %v1333_v3 = vshll.u32 %v508_v60, 8  ;;  %v858_v46 = vadd.s32 4294967169, %v608_v11 }
  0x7c   :  { %v1331_v14 = vsub.s32 %v456_v24, %v459_v15  ;;  %v515_v22 = vsub.s32 32, %v514_v61  ;;  %v612_v52 = vor.u32 8388608, %v611_v20  ;;  %v1336_v16 = vshrl.u32 %v512_v9, 5 }
  0x7d   :  { %v376_v21 = vxor.u32 2147483648, %v375_v62  ;;  %v517_v54 = vshll.u32 %v981_v2, %v514_v61  ;;  %v520_v56 = vshll.u32 %v982_v4, %v514_v61  ;;  %v523_v23 = vshll.u32 %v983_v6, %v514_v61 }
  0x7e   :  { %v462_v30 = vsub.s32 0, %v1331_v14  ;;  %v518_v39 = vshrl.u32 %v982_v4, %v515_v22  ;;  %v521_v19 = vshrl.u32 %v983_v6, %v515_v22  ;;  %v482_v36 = vsub.s32 4, %v1319_v57 }
  0x7f   :  { %v377_v1 = vsel %vm294_vm12, %v376_v21, %v375_v62  ;;  %v524_v38 = vshrl.u32 %v984_v8, %v515_v22  ;;  %vm398_vm10 = vcmp.lt.s32.totalorder %v1042_v55, 0  ;;  %v516_v28 = vshrl.u32 %v981_v2, %v515_v22 }
  0x80   :  { %v380_v26 = vsel %vm1266_vm1, %v1026_v32, %v377_v1  ;;  %v851_v25 = vmin.u32 %v462_v30, %v1331_v14  ;;  %v526_v29 = vshll.u32 %v984_v8, %v514_v61  ;;  %v614_v27 = vadd.s32 1, %v858_v46 }
  0x81   :  { %912 = vcosq.f32 %v380_v26  ;;  %v519_v41 = vor.u32 %v518_v39, %v517_v54  ;;  %v522_v40 = vor.u32 %v521_v19, %v520_v56  ;;  %vm391_vm11 = vcmp.eq.s32.totalorder %v1327_v17, 2 }
  0x82   :  { %914 = vsinq.f32 %v380_v26  ;;  %v464_v24 = vclz %v851_v25  ;;  %v525_v48 = vor.u32 %v524_v38, %v523_v23  ;;  %v527_v43 = vshrl.u32 %v985_v10, %v515_v22 }
  0x83   :  { %v529_v45 = vshll.u32 %v985_v10, %v514_v61  ;;  %vm532_vm12 = vcmp.lt.s32.totalorder %v1336_v16, 1  ;;  %vm388_vm13 = vcmp.eq.s32.totalorder %v1327_v17, 0  ;;  %v530_v47 = vshrl.u32 %v986_v18, %v515_v22 }
  0x84   :  { %v852_v50 = vadd.s32 4294967294, %v464_v24  ;;  %vm535_vm14 = vcmp.lt.s32.totalorder %v1336_v16, 4  ;;  %v1361_v0 = vshll.u32 %v612_v52, 8  ;;  %vm387_vm15 = vcmp.lt.s32.totalorder %v1327_v17, 2 }
  0x85   :  { %v528_v12 = vor.u32 %v527_v43, %v526_v29  ;;  %vm533_vm0 = vcmp.lt.s32.totalorder %v1336_v16, 2  ;;  %vm534_vm1 = vcmp.lt.s32.totalorder %v1336_v16, 3  ;;  %v536_v37 = vsel %vm532_vm12, %v516_v28, %v519_v41 }
  0x86   :  { %vm384_vm2 = vweird.f32 %v1026_v32  ;;  %vm853_vm3 = vcmp.lt.s32.totalorder %v852_v50, 0  ;;  %v531_v49 = vor.u32 %v530_v47, %v529_v45  ;;  %v537_v63 = vsel %vm535_vm14, %v525_v48, 2102212464 }
  0x87   :  { %v540_v42 = vsel %vm532_vm12, %v519_v41, %v522_v40  ;;  %v467_v58 = vsel %vm853_vm3, 0, %v852_v50  ;;  %v541_v60 = vsel %vm535_vm14, %v528_v12, 920167782  ;;  %v544_v53 = vsel %vm532_vm12, %v522_v40, %v525_v48 }
  0x88   :  { %vm615_vm4 = vcmp.gt.s32.totalorder %v614_v27, 0  ;;  %vm1379_vm5 = vcmp.le.f32.partialorder %v396_v51, 0.7853982  ;;  %v468_v5 = vsub.s32 32, %v467_v58  ;;  %v469_v7 = vshll.u32 %v1331_v14, %v467_v58 }
  0x89   :  { %v472_v9 = vsub.s32 4294967266, %v467_v58  ;;  %v542_v11 = vsel %vm534_vm1, %v525_v48, %v541_v60  ;;  %v538_v13 = vsel %vm534_vm1, %v522_v40, %v537_v63  ;;  %v545_v62 = vsel %vm535_vm14, %v531_v49, 1326507024 }
  0x8a   :  { %v543_v15 = vsel %vm533_vm0, %v540_v42, %v542_v11  ;;  %v616_v51 = vsel %vm615_vm4, %v614_v27, 0  ;;  %v470_v61 = vshrl.u32 %v452_v59, %v468_v5  ;;  %v483_v14 = vsel %vm398_vm10, %v482_v36, %v1319_v57 }
  0x8b   :  { %v473_v21 = vadd.s32 127, %v472_v9  ;;  %v546_v22 = vsel %vm534_vm1, %v528_v12, %v545_v62  ;;  %v913_v46 = vpop.eup %912  ;;  %v1400_v30 = vmul.u32.u64.low %v1333_v3, %v543_v15  ;;  %v1401_v54 = vmul.u32.u64.high %v1333_v3, %v543_v15, %v1400_v30 }
  0x8c   :  { %v547_v52 = vsel %vm533_vm0, %v544_v53, %v546_v22  ;;  %v618_v56 = vand.u32 31, %v616_v51  ;;  %v915_v1 = vpop.eup %914  ;;  %v392_v59 = vxor.u32 2147483648, %v913_v46  ;;  %v471_v39 = vor.u32 %v470_v61, %v469_v7 }
  0x8d   :  { %v474_v19 = vshll.u32 %v473_v21, 23  ;;  %v539_v57 = vsel %vm533_vm0, %v536_v37, %v538_v13  ;;  %v389_v23 = vxor.u32 2147483648, %v915_v1  ;;  %v558_v16 = vadd.s32 1, %v1401_v54 }
  0x8e   :  { %v1407_v26 = vmul.u32.u64.low %v1333_v3, %v547_v52  ;;  %v1408_v25 = vmul.u32.u64.high %v1333_v3, %v547_v52, %v1407_v26  ;;  %v619_v36 = vsub.s32 32, %v618_v56  ;;  %v393_v38 = vsel %vm391_vm11, %v392_v59, %v915_v1 }
  0x8f   :  { %v475_v28 = vor.u32 4788187, %v474_v19  ;;  %v478_v29 = vcvt.s32.f32 %v471_v39  ;;  %v621_v27 = vshll.u32 %v981_v2, %v618_v56  ;;  %v390_v24 = vsel %vm388_vm13, %v913_v46, %v389_v23 }
  0x90   :  { %v555_v41 = vmul.u32 %v1333_v3, %v539_v57  ;;  %v622_v40 = vshrl.u32 %v982_v4, %v619_v36  ;;  %v394_v48 = vsel %vm387_vm15, %v390_v24, %v393_v38  ;;  %v624_v45 = vshll.u32 %v982_v4, %v618_v56 }
  0x91   :  { %v476_v43 = vand.u32 2147483647, %v475_v28  ;;  %v625_v50 = vshrl.u32 %v983_v6, %v619_v36  ;;  %v395_v47 = vsel %vm384_vm2, nan, %v394_v48  ;;  %v485_v12 = vsel %vm1379_vm5, 0, %v483_v14 }
  0x92   :  { %vm557_vm6 = vc.u32 %v1408_v25, %v1400_v30  ;;  %v617_v3 = vshrl.u32 %v616_v51, 5  ;;  %v623_v17 = vor.u32 %v622_v40, %v621_v27  ;;  %v627_v63 = vshll.u32 %v983_v6, %v618_v56  ;;  %814 = vst [vmem:[#allocation5 + $0x10] sm:$0xff] %v395_v47 }
  0x93   :  { %v479_v37 = vmul.f32 %v478_v29, %v476_v43  ;;  %v559_v49 = vsel %vm557_vm6, %v558_v16, %v1401_v54  ;;  %v628_v58 = vshrl.u32 %v984_v8, %v619_v36  ;;  %v630_v32 = vshll.u32 %v984_v8, %v618_v56 }
  0x94   :  { %v560_v42 = vadd.s32 %v559_v49, %v555_v41  ;;  %v631_v60 = vshrl.u32 %v985_v10, %v619_v36  ;;  %v626_v5 = vor.u32 %v625_v50, %v624_v45  ;;  %v633_v7 = vshll.u32 %v985_v10, %v618_v56 }
  0x95   :  { %v480_v53 = vxor.u32 2147483648, %v479_v37  ;;  %v634_v9 = vshrl.u32 %v986_v18, %v619_v36  ;;  %v629_v13 = vor.u32 %v628_v58, %v627_v63  ;;  %vm636_vm7 = vcmp.lt.s32.totalorder %v617_v3, 1 }
  0x96   :  { %v561_v11 = vadd.s32 536870912, %v560_v42  ;;  %v632_v15 = vor.u32 %v631_v60, %v630_v32  ;;  %v620_v51 = vshrl.u32 %v981_v2, %v619_v36  ;;  %vm639_vm8 = vcmp.lt.s32.totalorder %v617_v3, 4 }
  0x97   :  { %v481_v62 = vsel %vm398_vm10, %v480_v53, %v479_v37  ;;  %v635_v61 = vor.u32 %v634_v9, %v633_v7  ;;  %vm638_vm9 = vcmp.lt.s32.totalorder %v617_v3, 3  ;;  %v641_v22 = vsel %vm639_vm8, %v629_v13, 2102212464 }
  0x98   :  { %v484_v21 = vsel %vm1379_vm5, %v1042_v55, %v481_v62  ;;  %v1441_v14 = vshrl.u32 %v561_v11, 30  ;;  %vm637_vm11 = vcmp.lt.s32.totalorder %v617_v3, 2  ;;  %v644_v46 = vsel %vm636_vm7, %v623_v17, %v626_v5 }
  0x99   :  { %916 = vcosq.f32 %v484_v21  ;;  %v645_v52 = vsel %vm639_vm8, %v632_v15, 920167782  ;;  %v489_v54 = vadd.s32 3, %v485_v12  ;;  %v648_v1 = vsel %vm636_vm7, %v626_v5, %v629_v13 }
  0x9a   :  { %918 = vsinq.f32 %v484_v21  ;;  %v563_v56 = vshll.u32 %v1441_v14, 30  ;;  %v640_v20 = vsel %vm636_vm7, %v620_v51, %v623_v17  ;;  %v642_v59 = vsel %vm638_vm9, %v626_v5, %v641_v22 }
  0x9b   :  { %v646_v39 = vsel %vm638_vm9, %v629_v13, %v645_v52  ;;  %v649_v19 = vsel %vm639_vm8, %v635_v61, 1326507024  ;;  %v643_v27 = vsel %vm637_vm11, %v640_v20, %v642_v59  ;;  %v490_v16 = vand.u32 3, %v489_v54 }
  0x9c   :  { %v564_v57 = vsub.s32 %v560_v42, %v563_v56  ;;  %v647_v23 = vsel %vm637_vm11, %v644_v46, %v646_v39  ;;  %v650_v26 = vsel %vm638_vm9, %v632_v15, %v649_v19  ;;  %v711_v40 = vand.u32 2139095040, %v1030_v34 }
  0x9d   :  { %v651_v36 = vsel %vm637_vm11, %v648_v1, %v650_v26  ;;  %v1456_v38 = vmul.u32.u64.low %v1361_v0, %v647_v23  ;;  %v1457_v28 = vmul.u32.u64.high %v1361_v0, %v647_v23, %v1456_v38  ;;  %v659_v43 = vmul.u32 %v1361_v0, %v643_v27 }
  0x9e   :  { %v566_v29 = vsub.s32 0, %v564_v57  ;;  %v1462_v24 = vmul.u32.u64.low %v1361_v0, %v651_v36  ;;  %v1463_v41 = vmul.u32.u64.high %v1361_v0, %v651_v36, %v1462_v24  ;;  %v712_v50 = vshrl.u32 %v711_v40, 23 }
  0x9f   :  { %v662_v45 = vadd.s32 1, %v1457_v28  ;;  %vm488_vm10 = vweird.f32 %v1042_v55  ;;  %vm491_vm12 = vcmp.lt.s32.totalorder %v490_v16, 2  ;;  %vm495_vm13 = vcmp.eq.s32.totalorder %v490_v16, 2 }
  0xa0   :  { %v855_v48 = vmin.u32 %v566_v29, %v564_v57  ;;  %vm661_vm14 = vc.u32 %v1463_v41, %v1456_v38  ;;  %v862_v3 = vadd.s32 4294967169, %v712_v50  ;;  %vm492_vm15 = vcmp.eq.s32.totalorder %v490_v16, 0 }
  0xa1   :  { %v663_v63 = vsel %vm661_vm14, %v662_v45, %v1457_v28  ;;  %v708_v58 = vand.u32 2147483647, %v1030_v34  ;;  %v556_v53 = vadd.s32 %v1400_v30, %v1408_v25  ;;  %v586_v5 = vsub.s32 4, %v1441_v14 }
  0xa2   :  { %v568_v47 = vclz %v855_v48  ;;  %v664_v42 = vadd.s32 %v663_v63, %v659_v43  ;;  %v718_v32 = vadd.s32 1, %v862_v3  ;;  %vm502_vm2 = vcmp.lt.s32.totalorder %v1024_v31, 0 }
  0xa3   :  { %v917_v12 = vpop.eup %916  ;;  %v715_v30 = vand.u32 8388607, %v708_v58  ;;  %vm1487_vm3 = vcmp.le.f32.partialorder %v500_v35, 0.7853982  ;;  %v587_v59 = vsel %vm502_vm2, %v586_v5, %v1441_v14  ;;  %v660_v45 = vadd.s32 %v1456_v38, %v1463_v41 }
  0xa4   :  { %v919_v37 = vpop.eup %918  ;;  %v496_v49 = vxor.u32 2147483648, %v917_v12  ;;  %v856_v17 = vadd.s32 4294967294, %v568_v47  ;;  %v665_v11 = vadd.s32 536870912, %v664_v42  ;;  %vm719_vm1 = vcmp.gt.s32.totalorder %v718_v32, 0 }
  0xa5   :  { %v493_v0 = vxor.u32 2147483648, %v919_v37  ;;  %v720_v25 = vsel %vm719_vm1, %v718_v32, 0  ;;  %v716_v19 = vor.u32 8388608, %v715_v30  ;;  %v589_v43 = vsel %vm1487_vm3, 0, %v587_v59 }
  0xa6   :  { %v497_v60 = vsel %vm495_vm13, %v496_v49, %v919_v37  ;;  %vm857_vm0 = vcmp.lt.s32.totalorder %v856_v17, 0  ;;  %v1479_v21 = vshrl.u32 %v665_v11, 30  ;;  %v722_v52 = vand.u32 31, %v720_v25 }
  0xa7   :  { %v494_v7 = vsel %vm492_vm15, %v917_v12, %v493_v0  ;;  %v571_v9 = vsel %vm857_vm0, 0, %v856_v17  ;;  %vm592_vm11 = vweird.f32 %v1024_v31  ;;  %vm1539_vm14 = vcmp.le.f32.partialorder %v604_v44, 0.7853982 }
  0xa8   :  { %v498_v13 = vsel %vm491_vm12, %v494_v7, %v497_v60  ;;  %v572_v15 = vsub.s32 32, %v571_v9  ;;  %v573_v62 = vshll.u32 %v564_v57, %v571_v9  ;;  %v576_v51 = vsub.s32 4294967266, %v571_v9 }
  0xa9   :  { %v499_v61 = vsel %vm488_vm10, nan, %v498_v13  ;;  %v667_v54 = vshll.u32 %v1479_v21, 30  ;;  %v723_v20 = vsub.s32 32, %v722_v52  ;;  %v721_v57 = vshrl.u32 %v720_v25, 5 }
  0xaa   :  { %v574_v22 = vshrl.u32 %v556_v53, %v572_v15  ;;  %v577_v46 = vadd.s32 127, %v576_v51  ;;  %815 = vst [vmem:[#allocation5 + $0x18] sm:$0xff] %v499_v61  ;;  %v725_v36 = vshll.u32 %v981_v2, %v722_v52  ;;  %v728_v28 = vshll.u32 %v982_v4, %v722_v52 }
  0xab   :  { %v668_v39 = vsub.s32 %v664_v42, %v667_v54  ;;  %v726_v29 = vshrl.u32 %v982_v4, %v723_v20  ;;  %v729_v27 = vshrl.u32 %v983_v6, %v723_v20  ;;  %v731_v24 = vshll.u32 %v983_v6, %v722_v52 }
  0xac   :  { %v575_v55 = vor.u32 %v574_v22, %v573_v62  ;;  %v578_v1 = vshll.u32 %v577_v46, 23  ;;  %v732_v40 = vshrl.u32 %v984_v8, %v723_v20  ;;  %v734_v14 = vshll.u32 %v984_v8, %v722_v52 }
  0xad   :  { %v670_v35 = vsub.s32 0, %v668_v39  ;;  %v735_v48 = vshrl.u32 %v985_v10, %v723_v20  ;;  %v724_v4 = vshrl.u32 %v981_v2, %v723_v20  ;;  %v737_v12 = vshll.u32 %v985_v10, %v722_v52 }
  0xae   :  { %v579_v23 = vor.u32 4788187, %v578_v1  ;;  %v582_v26 = vcvt.s32.f32 %v575_v55  ;;  %v756_v6 = vshll.u32 %v716_v19, 8  ;;  %v727_v37 = vor.u32 %v726_v29, %v725_v36 }
  0xaf   :  { %v859_v50 = vmin.u32 %v670_v35, %v668_v39  ;;  %v730_v49 = vor.u32 %v729_v27, %v728_v28  ;;  %v736_v17 = vor.u32 %v735_v48, %v734_v14  ;;  %v733_v63 = vor.u32 %v732_v40, %v731_v24 }
  0xb0   :  { %v580_v16 = vand.u32 2147483647, %v579_v23  ;;  %v738_v0 = vshrl.u32 %v986_v18, %v723_v20  ;;  %vm740_vm4 = vcmp.lt.s32.totalorder %v721_v57, 1  ;;  %vm741_vm5 = vcmp.lt.s32.totalorder %v721_v57, 2 }
  0xb1   :  { %v672_v3 = vclz %v859_v50  ;;  %vm742_vm6 = vcmp.lt.s32.totalorder %v721_v57, 3  ;;  %vm743_vm7 = vcmp.lt.s32.totalorder %v721_v57, 4  ;;  %v744_v10 = vsel %vm740_vm4, %v724_v4, %v727_v37 }
  0xb2   :  { %v583_v47 = vmul.f32 %v582_v26, %v580_v16  ;;  %v739_v2 = vor.u32 %v738_v0, %v737_v12  ;;  %v745_v41 = vsel %vm743_vm7, %v733_v63, 2102212464  ;;  %v748_v18 = vsel %vm740_vm4, %v727_v37, %v730_v49 }
  0xb3   :  { %v860_v42 = vadd.s32 4294967294, %v672_v3  ;;  %v749_v60 = vsel %vm743_vm7, %v736_v17, 920167782  ;;  %v746_v5 = vsel %vm742_vm6, %v730_v49, %v745_v41  ;;  %v593_v15 = vadd.s32 3, %v589_v43 }
  0xb4   :  { %v584_v8 = vxor.u32 2147483648, %v583_v47  ;;  %v750_v7 = vsel %vm742_vm6, %v733_v63, %v749_v60  ;;  %v752_v51 = vsel %vm740_vm4, %v730_v49, %v733_v63  ;;  %v753_v61 = vsel %vm743_vm7, %v739_v2, 1326507024 }
  0xb5   :  { %vm861_vm8 = vcmp.lt.s32.totalorder %v860_v42, 0  ;;  %v751_v62 = vsel %vm741_vm5, %v748_v18, %v750_v7  ;;  %v754_v22 = vsel %vm742_vm6, %v736_v17, %v753_v61  ;;  %v747_v46 = vsel %vm741_vm5, %v744_v10, %v746_v5 }
  0xb6   :  { %v585_v38 = vsel %vm502_vm2, %v584_v8, %v583_v47  ;;  %v675_v53 = vsel %vm861_vm8, 0, %v860_v42  ;;  %v755_v52 = vsel %vm741_vm5, %v752_v51, %v754_v22  ;;  %v763_v26 = vmul.u32 %v756_v6, %v747_v46 }
  0xb7   :  { %v588_v32 = vsel %vm1487_vm3, %v1024_v31, %v585_v38  ;;  %v676_v9 = vsub.s32 32, %v675_v53  ;;  %v677_v11 = vshll.u32 %v668_v39, %v675_v53  ;;  %v680_v13 = vsub.s32 4294967266, %v675_v53 }
  0xb8   :  { %920 = vcosq.f32 %v588_v32  ;;  %v1526_v54 = vmul.u32.u64.low %v756_v6, %v751_v62  ;;  %v1527_v56 = vmul.u32.u64.high %v756_v6, %v751_v62, %v1526_v54  ;;  %v594_v39 = vand.u32 3, %v593_v15 }
  0xb9   :  { %922 = vsinq.f32 %v588_v32  ;;  %v678_v30 = vshrl.u32 %v660_v45, %v676_v9  ;;  %v681_v25 = vadd.s32 127, %v680_v13  ;;  %v690_v35 = vsub.s32 4, %v1479_v21 }
  0xba   :  { %v1529_v20 = vmul.u32.u64.low %v756_v6, %v755_v52  ;;  %v1530_v59 = vmul.u32.u64.high %v756_v6, %v755_v52, %v1529_v20  ;;  %v766_v36 = vadd.s32 1, %v1527_v56  ;;  %vm599_vm10 = vcmp.eq.s32.totalorder %v594_v39, 2 }
  0xbb   :  { %v679_v55 = vor.u32 %v678_v30, %v677_v11  ;;  %v682_v1 = vshll.u32 %v681_v25, 23  ;;  %vm596_vm12 = vcmp.eq.s32.totalorder %v594_v39, 0  ;;  %vm595_vm13 = vcmp.lt.s32.totalorder %v594_v39, 2 }
  0xbc   :  { %vm765_vm9 = vc.u32 %v1530_v59, %v1526_v54  ;;  %vm606_vm15 = vcmp.lt.s32.totalorder %v1028_v33, 0  ;;  %v764_v18 = vadd.s32 %v1526_v54, %v1530_v59  ;;  %vm696_vm4 = vweird.f32 %v1028_v33 }
  0xbd   :  { %v683_v19 = vor.u32 4788187, %v682_v1  ;;  %v686_v23 = vcvt.s32.f32 %v679_v55  ;;  %v767_v29 = vsel %vm765_vm9, %v766_v36, %v1527_v56  ;;  %v691_v50 = vsel %vm606_vm15, %v690_v35, %v1479_v21 }
  0xbe   :  { %v768_v40 = vadd.s32 %v767_v29, %v763_v26  ;;  %v693_v49 = vsel %vm1539_vm14, 0, %v691_v50  ;;  %vm710_vm5 = vcmp.lt.s32.totalorder %v1030_v34, 0  ;;  %vm709_vm6 = vcmp.le.f32.partialorder %v708_v58, 0.7853982 }
  0xbf   :  { %v684_v28 = vand.u32 2147483647, %v683_v19  ;;  %v697_v21 = vadd.s32 3, %v693_v49 }
  0xc0   :  { %v769_v47 = vadd.s32 536870912, %v768_v40 }
  0xc1   :  { %v687_v16 = vmul.f32 %v686_v23, %v684_v28  ;;  %v698_v0 = vand.u32 3, %v697_v21 }
  0xc2   :  { %v921_v57 = vpop.eup %920  ;;  %v770_v3 = vshrl.u32 %v769_v47, 30 }
  0xc3   :  { %v923_v27 = vpop.eup %922  ;;  %v600_v24 = vxor.u32 2147483648, %v921_v57  ;;  %v688_v45 = vxor.u32 2147483648, %v687_v16  ;;  %vm703_vm0 = vcmp.eq.s32.totalorder %v698_v0, 2  ;;  %vm700_vm1 = vcmp.eq.s32.totalorder %v698_v0, 0 }
  0xc4   :  { %v597_v14 = vxor.u32 2147483648, %v923_v27  ;;  %v771_v17 = vshll.u32 %v770_v3, 30  ;;  %vm699_vm2 = vcmp.lt.s32.totalorder %v698_v0, 2  ;;  %v794_v52 = vsub.s32 4, %v770_v3 }
  0xc5   :  { %v601_v43 = vsel %vm599_vm10, %v600_v24, %v923_v27  ;;  %v689_v6 = vsel %vm606_vm15, %v688_v45, %v687_v16 }
  0xc6   :  { %v598_v4 = vsel %vm596_vm12, %v921_v57, %v597_v14  ;;  %v692_v44 = vsel %vm1539_vm14, %v1028_v33, %v689_v6  ;;  %v772_v8 = vsub.s32 %v768_v40, %v771_v17  ;;  %v795_v56 = vsel %vm710_vm5, %v794_v52, %v770_v3 }
  0xc7   :  { %v602_v12 = vsel %vm595_vm13, %v598_v4, %v601_v43  ;;  %924 = vcosq.f32 %v692_v44  ;;  %v797_v20 = vsel %vm709_vm6, 0, %v795_v56 }
  0xc8   :  { %v603_v37 = vsel %vm592_vm11, nan, %v602_v12  ;;  %926 = vsinq.f32 %v692_v44  ;;  %v774_v63 = vsub.s32 0, %v772_v8  ;;  %v801_v59 = vadd.s32 3, %v797_v20 }
  0xc9   :  { %816 = vst [vmem:[#allocation5 + $0x20] sm:$0xff] %v603_v37  ;;  %vm800_vm11 = vweird.f32 %v1030_v34 }
  0xca   :  { %v863_v42 = vmin.u32 %v774_v63, %v772_v8  ;;  %v802_v39 = vand.u32 3, %v801_v59 }
  0xcc   :  { %v776_v38 = vclz %v863_v42  ;;  %vm807_vm7 = vcmp.eq.s32.totalorder %v802_v39, 2  ;;  %vm804_vm8 = vcmp.eq.s32.totalorder %v802_v39, 0  ;;  %vm803_vm9 = vcmp.lt.s32.totalorder %v802_v39, 2 }
  0xce   :  { %v864_v31 = vadd.s32 4294967294, %v776_v38 }
  0xd0   :  { %vm865_vm3 = vcmp.lt.s32.totalorder %v864_v31, 0 }
  0xd1   :  { %v925_v2 = vpop.eup %924  ;;  %v779_v53 = vsel %vm865_vm3, 0, %v864_v31 }
  0xd2   :  { %v927_v10 = vpop.eup %926  ;;  %v704_v41 = vxor.u32 2147483648, %v925_v2  ;;  %v780_v7 = vsub.s32 32, %v779_v53  ;;  %v781_v9 = vshll.u32 %v772_v8, %v779_v53  ;;  %v784_v11 = vsub.s32 4294967266, %v779_v53 }
  0xd3   :  { %v701_v32 = vxor.u32 2147483648, %v927_v10 }
  0xd4   :  { %v705_v60 = vsel %vm703_vm0, %v704_v41, %v927_v10  ;;  %v782_v62 = vshrl.u32 %v764_v18, %v780_v7  ;;  %v785_v51 = vadd.s32 127, %v784_v11 }
  0xd5   :  { %v702_v5 = vsel %vm700_vm1, %v925_v2, %v701_v32 }
  0xd6   :  { %v706_v13 = vsel %vm699_vm2, %v702_v5, %v705_v60  ;;  %v783_v61 = vor.u32 %v782_v62, %v781_v9  ;;  %v786_v30 = vshll.u32 %v785_v51, 23 }
  0xd7   :  { %v707_v15 = vsel %vm696_vm4, nan, %v706_v13 }
  0xd8   :  { %817 = vst [vmem:[#allocation5 + $0x28] sm:$0xff] %v707_v15  ;;  %v787_v25 = vor.u32 4788187, %v786_v30  ;;  %v790_v22 = vcvt.s32.f32 %v783_v61 }
  0xda   :  { %v788_v46 = vand.u32 2147483647, %v787_v25 }
  0xdc   :  { %v791_v54 = vmul.f32 %v790_v22, %v788_v46 }
  0xde   :  { %v792_v33 = vxor.u32 2147483648, %v791_v54 }
  0xe0   :  { %v793_v55 = vsel %vm710_vm5, %v792_v33, %v791_v54 }
  0xe1   :  { %v796_v1 = vsel %vm709_vm6, %v1030_v34, %v793_v55 }
  0xe2   :  { %928 = vcosq.f32 %v796_v1 }
  0xe3   :  { %930 = vsinq.f32 %v796_v1 }
  0xec   :  { %v929_v19 = vpop.eup %928 }
  0xed   :  { %v931_v23 = vpop.eup %930  ;;  %v808_v26 = vxor.u32 2147483648, %v929_v19 }
  0xee   :  { %v805_v36 = vxor.u32 2147483648, %v931_v23 }
  0xef   :  { %v809_v58 = vsel %vm807_vm7, %v808_v26, %v931_v23 }
  0xf0   :  { %v806_v28 = vsel %vm804_vm8, %v929_v19, %v805_v36 }
  0xf1   :  { %v810_v35 = vsel %vm803_vm9, %v806_v28, %v809_v58 }
  0xf2   :  { %v811_v57 = vsel %vm800_vm11, nan, %v810_v35 }
  0xf3   :  { %818 = vst [vmem:[#allocation5 + $0x30] sm:$0x3] %v811_v57 }
  0xf4   :  { %965 = shalt.err (!%p962_p12)
}
  0xf5   :  { %s966_s27 = scalar_lea.hbm %s1573_s2, 896 }
  0xf6   :  { %p967_p13 = scmp.ne.s32.totalorder %s1573_s2, %s966_s27  ;;  %p970_p0 = scmp.lt.u32.totalorder %s966_s27, %s1573_s2 }
  0xf8   :  { %p972_p1 = pnand %p970_p0, %p967_p13 }
  0xfa   :  { %975 = shalt.err (!%p972_p1)
}
  0xfb   :  { %s988_s4 = smov 128   ;;  %s989_s5 = smov 8  }
  0xfc   :  { %830 = dma.vmem_to_hbm [thread:$0]  %s825_s23, 896, %s1573_s2, [#allocation4], %s988_s4, %s988_s4, %s989_s5  }
  0xfd   :  { %978 = dma.done.wait [#allocation4], 896  }
  0xfe   :  { %979 = vsyncadd [#allocation4], 4294966400 }
  0xff   :  { %834 = vsyncpa [#allocation3], 1 }
 0x100   :  { %835 = vsyncpa [#allocation4], 1 }

</bundles_post_ra>
